<compile_context>
chip_gen: v6e
topology: v6e:2x2x1
jax: 0.10.0
libtpu: 0.0.40
codegen_flags: <defaults>
</compile_context>

<pallas_src>
import jax
import jax.numpy as jnp
from jax.experimental import pallas as pl
from jax.experimental.pallas import tpu as pltpu


def qnet_kernel(s_ref, a_ref, w1s_ref, w1a_ref, b1_ref, w2_ref, b2_ref,
                w3_ref, b3_ref, o_ref):
    # s_ref:   [TB, state_dim]      a_ref: [TB, action_dim]      (f32 or bf16)
    # w1s_ref: [state_dim, H]       w1a_ref: [action_dim, H]     b1_ref: [1, H]
    # w2_ref:  [H, H]               b2_ref: [1, H]
    # w3_ref:  [1, H]  (row form)   b3_ref: [1, 1]
    # o_ref:   [1, TB]  (lane-dense: batch along lanes)

    # Layer 1: fused concat via split weights; accumulate in f32 on the MXU.
    h1 = (jnp.dot(s_ref[...], w1s_ref[...], preferred_element_type=jnp.float32)
          + jnp.dot(a_ref[...], w1a_ref[...], preferred_element_type=jnp.float32)
          + b1_ref[...])
    h1 = jnp.maximum(h1, 0.0)

    # Layer 2.
    h2 = jnp.dot(h1, w2_ref[...], preferred_element_type=jnp.float32) + b2_ref[...]
    h2 = jnp.maximum(h2, 0.0)

    # Layer 3: (1, H) contracted with (TB, H) on H -> (1, TB)  (trans-B form).
    # Yields the batch laid along lanes directly, so the store below is an
    # unmasked lane-dense vst instead of a 1/128-utilized masked store of [TB, 1].
    q = jax.lax.dot_general(
        w3_ref[...], h2,
        dimension_numbers=(((1,), (1,)), ((), ())),
        preferred_element_type=jnp.float32,
    ) + b3_ref[...]

    o_ref[...] = q.astype(o_ref.dtype)


def _round_up(x, m):
    return ((x + m - 1) // m) * m


def _select_batch_tiling(B, tb_max):
    """Pick (batch_tile, padded_batch).

    * tile is a multiple of 128 -> (1, tile) output block is lane-legal for any grid.
    * tiles are balanced (cdiv first), so e.g. B=513 pads to 768, not 1024.
    * >= 2 grid steps whenever there are >= 2 full lane-tiles of work, so v7x's two
      TensorCores both get batch tiles via the "parallel" dimension semantics.
    """
    b128 = _round_up(max(B, 1), 128)
    n_tiles = pl.cdiv(b128, tb_max)
    if n_tiles < 2 and b128 >= 256:
        n_tiles = 2
    tb = _round_up(pl.cdiv(b128, n_tiles), 128)
    return tb, n_tiles * tb


def qnetwork_forward(state, action, params, *, tb_max=2048,
                     activation_dtype=jnp.bfloat16):
    """JAX wrapper: batch-tiled fused 3-layer MLP (concat fused via split W1)."""
    w1, b1, w2, b2, w3, b3 = params
    B, state_dim = state.shape
    action_dim = action.shape[1]
    H = w1.shape[1]

    # Split W1 so the kernel never materializes cat([state, action], 1).
    w1s = w1[:state_dim]
    w1a = w1[state_dim:]
    w3_row = w3.reshape(1, H)  # (H, 1) -> (1, H)

    tb, b_pad = _select_batch_tiling(B, tb_max)
    if b_pad != B:
        pad = ((0, b_pad - B), (0, 0))
        state = jnp.pad(state, pad)
        action = jnp.pad(action, pad)

    # The streamed activations dominate HBM traffic at large B: bf16 halves their
    # bytes (and doubles MXU rate where applicable).  Dots accumulate in f32.
    state = state.astype(activation_dtype)
    action = action.astype(activation_dtype)

    grid = (b_pad // tb,)

    def batch_spec(d):
        return pl.BlockSpec((tb, d), lambda i: (i, 0))

    def const_spec(shape):
        # Same block every grid step -> stays resident in VMEM, no re-DMA.
        # TODO(synk): if H is ever scaled to >= 2048, add pipeline_mode=pl.Buffered(1)
        # here and/or store w2 in bf16 so the resident weights fit v7x's 64 MiB VMEM.
        return pl.BlockSpec(shape, lambda i: (0, 0))

    out = pl.pallas_call(
        qnet_kernel,
        out_shape=jax.ShapeDtypeStruct((1, b_pad), jnp.float32),
        grid_spec=pltpu.PrefetchScalarGridSpec(
            num_scalar_prefetch=0,
            grid=grid,
            in_specs=[
                batch_spec(state_dim),
                batch_spec(action_dim),
                const_spec(w1s.shape),
                const_spec(w1a.shape),
                const_spec(b1.shape),
                const_spec(w2.shape),
                const_spec(b2.shape),
                const_spec(w3_row.shape),
                const_spec(b3.shape),
            ],
            out_specs=pl.BlockSpec((1, tb), lambda i: (0, i)),
        ),
        compiler_params=pltpu.CompilerParams(
            dimension_semantics=("parallel",),  # independent batch tiles (v7x megacore)
        ),
    )(state, action, w1s, w1a, b1, w2, b2, w3_row, b3)

    # Lane-dense (1, B_pad) kernel output -> PyTorch-style [B, 1].
    return out[0, :B].reshape(B, 1)


def init_params(key, input_dim, hidden_dim, init_w=0.003):
    """Init mirroring the PyTorch module (weights stored pre-transposed: [in, out])."""
    k1, k2, k3, k4, k5, k6 = jax.random.split(key, 6)

    bound1 = 1.0 / (input_dim ** 0.5)
    w1 = jax.random.uniform(k1, (input_dim, hidden_dim), jnp.float32, -bound1, bound1)
    b1 = jax.random.uniform(k2, (1, hidden_dim), jnp.float32, -bound1, bound1)

    bound2 = 1.0 / (hidden_dim ** 0.5)
    w2 = jax.random.uniform(k3, (hidden_dim, hidden_dim), jnp.float32, -bound2, bound2)
    b2 = jax.random.uniform(k4, (1, hidden_dim), jnp.float32, -bound2, bound2)

    w3 = jax.random.uniform(k5, (hidden_dim, 1), jnp.float32, -init_w, init_w)
    b3 = jax.random.uniform(k6, (1, 1), jnp.float32, -init_w, init_w)

    return (w1, b1, w2, b2, w3, b3)


def reference_forward(state, action, params):
    """Pure-JAX reference of the PyTorch forward, for verification."""
    w1, b1, w2, b2, w3, b3 = params
    x = jnp.concatenate([state, action], axis=1)
    x = jnp.maximum(x @ w1 + b1, 0.0)
    x = jnp.maximum(x @ w2 + b2, 0.0)
    return x @ w3 + b3


if __name__ == "__main__":
    key = jax.random.PRNGKey(0)
    k_state, k_action, k_params = jax.random.split(key, 3)

    state_dim = 12
    action_dim = 4
    hidden_dim = 32
    params = init_params(k_params, state_dim + action_dim, hidden_dim, init_w=0.003)

    # Small batch (single-tile path), f32 streams -> exact match vs the reference.
    batch = 8
    state = jax.random.normal(k_state, (batch, state_dim), jnp.float32)
    action = jax.random.normal(k_action, (batch, action_dim), jnp.float32)

    q = jax.block_until_ready(
        qnetwork_forward(state, action, params, activation_dtype=jnp.float32))
    q_ref = reference_forward(state, action, params)
    assert q.shape == (batch, 1)
    assert jnp.allclose(q, q_ref, atol=1e-5, rtol=1e-5), "mismatch (small, f32)"

    # Same inputs through the default bf16 streamed-activation path (f32 accumulation).
    q_bf = jax.block_until_ready(qnetwork_forward(state, action, params))
    assert jnp.allclose(q_bf, q_ref, atol=1e-2, rtol=5e-2), "mismatch (small, bf16)"

    # Larger, non-aligned batches: exercise balanced multi-tile pipelined grids.
    #   B=1000 -> tb=512, grid=(2,);  B=4500 -> tb=1536, grid=(3,).
    for batch_l, seed in ((1000, 1), (4500, 2)):
        k_sl, k_al = jax.random.split(jax.random.PRNGKey(seed))
        state_l = jax.random.normal(k_sl, (batch_l, state_dim), jnp.float32)
        action_l = jax.random.normal(k_al, (batch_l, action_dim), jnp.float32)

        q_l = jax.block_until_ready(qnetwork_forward(state_l, action_l, params))
        q_l_ref = reference_forward(state_l, action_l, params)
        assert q_l.shape == (batch_l, 1)
        assert jnp.allclose(q_l, q_l_ref, atol=1e-2, rtol=5e-2), \
            f"mismatch vs JAX reference (B={batch_l})"

    print("KERNEL_OK")
</pallas_src>

<mosaic_0001>
module attributes {stable_mosaic.version = 11 : i64} {
  func.func @qnet_kernel(%arg0: i32, %arg1: memref<128x12xf32, #tpu.memory_space<vmem>>, %arg2: memref<128x4xf32, #tpu.memory_space<vmem>>, %arg3: memref<12x32xf32, #tpu.memory_space<vmem>>, %arg4: memref<4x32xf32, #tpu.memory_space<vmem>>, %arg5: memref<1x32xf32, #tpu.memory_space<vmem>>, %arg6: memref<32x32xf32, #tpu.memory_space<vmem>>, %arg7: memref<1x32xf32, #tpu.memory_space<vmem>>, %arg8: memref<1x32xf32, #tpu.memory_space<vmem>>, %arg9: memref<1x1xf32, #tpu.memory_space<vmem>>, %arg10: memref<1x128xf32, #tpu.memory_space<vmem>>) attributes {dimension_semantics = [#tpu.dimension_semantics<parallel>], iteration_bounds = array<i64: 1>, scalar_prefetch = 0 : i64, scratch_operands = 0 : i64, tpu.core_type = #tpu.core_type<tc>, window_params = [{transform_indices = @transform_0, window_bounds = array<i64: 128, 12>}, {transform_indices = @transform_1, window_bounds = array<i64: 128, 4>}, {pipeline_mode = #tpu.pipeline_mode<synchronous>, transform_indices = @transform_2, window_bounds = array<i64: 12, 32>}, {pipeline_mode = #tpu.pipeline_mode<synchronous>, transform_indices = @transform_3, window_bounds = array<i64: 4, 32>}, {pipeline_mode = #tpu.pipeline_mode<synchronous>, transform_indices = @transform_4, window_bounds = array<i64: 1, 32>}, {pipeline_mode = #tpu.pipeline_mode<synchronous>, transform_indices = @transform_5, window_bounds = array<i64: 32, 32>}, {pipeline_mode = #tpu.pipeline_mode<synchronous>, transform_indices = @transform_6, window_bounds = array<i64: 1, 32>}, {pipeline_mode = #tpu.pipeline_mode<synchronous>, transform_indices = @transform_7, window_bounds = array<i64: 1, 32>}, {pipeline_mode = #tpu.pipeline_mode<synchronous>, transform_indices = @transform_8, window_bounds = array<i64: 1, 1>}, {transform_indices = @transform_9, window_bounds = array<i64: 1, 128>}]} {
    %c0 = arith.constant 0 : index
    %c0_0 = arith.constant 0 : index
    %0 = vector.load %arg1[%c0, %c0_0] : memref<128x12xf32, #tpu.memory_space<vmem>>, vector<128x12xf32>
    %c0_1 = arith.constant 0 : index
    %c0_2 = arith.constant 0 : index
    %1 = vector.load %arg3[%c0_1, %c0_2] : memref<12x32xf32, #tpu.memory_space<vmem>>, vector<12x32xf32>
    %cst = arith.constant dense<0.000000e+00> : vector<128x32xf32>
    %2 = tpu.matmul %0, %1, %cst {dimension_numbers = #tpu.dot_dimension_numbers<[1], [0], [0], [1], [0, 0, 1, 1], [], []>} : vector<128x12xf32>, vector<12x32xf32>, vector<128x32xf32> -> vector<128x32xf32>
    %c0_3 = arith.constant 0 : index
    %c0_4 = arith.constant 0 : index
    %3 = vector.load %arg2[%c0_3, %c0_4] : memref<128x4xf32, #tpu.memory_space<vmem>>, vector<128x4xf32>
    %c0_5 = arith.constant 0 : index
    %c0_6 = arith.constant 0 : index
    %4 = vector.load %arg4[%c0_5, %c0_6] : memref<4x32xf32, #tpu.memory_space<vmem>>, vector<4x32xf32>
    %cst_7 = arith.constant dense<0.000000e+00> : vector<128x32xf32>
    %5 = tpu.matmul %3, %4, %cst_7 {dimension_numbers = #tpu.dot_dimension_numbers<[1], [0], [0], [1], [0, 0, 1, 1], [], []>} : vector<128x4xf32>, vector<4x32xf32>, vector<128x32xf32> -> vector<128x32xf32>
    %6 = arith.addf %2, %5 : vector<128x32xf32>
    %c0_8 = arith.constant 0 : index
    %c0_9 = arith.constant 0 : index
    %7 = vector.load %arg5[%c0_8, %c0_9] : memref<1x32xf32, #tpu.memory_space<vmem>>, vector<1x32xf32>
    %8 = vector.broadcast %7 : vector<1x32xf32> to vector<128x32xf32>
    %9 = arith.addf %6, %8 : vector<128x32xf32>
    %cst_10 = arith.constant 0.000000e+00 : f32
    %10 = vector.broadcast %cst_10 : f32 to vector<128x32xf32>
    %11 = arith.maximumf %9, %10 : vector<128x32xf32>
    %c0_11 = arith.constant 0 : index
    %c0_12 = arith.constant 0 : index
    %12 = vector.load %arg6[%c0_11, %c0_12] : memref<32x32xf32, #tpu.memory_space<vmem>>, vector<32x32xf32>
    %cst_13 = arith.constant dense<0.000000e+00> : vector<128x32xf32>
    %13 = tpu.matmul %11, %12, %cst_13 {dimension_numbers = #tpu.dot_dimension_numbers<[1], [0], [0], [1], [0, 0, 1, 1], [], []>} : vector<128x32xf32>, vector<32x32xf32>, vector<128x32xf32> -> vector<128x32xf32>
    %c0_14 = arith.constant 0 : index
    %c0_15 = arith.constant 0 : index
    %14 = vector.load %arg7[%c0_14, %c0_15] : memref<1x32xf32, #tpu.memory_space<vmem>>, vector<1x32xf32>
    %15 = vector.broadcast %14 : vector<1x32xf32> to vector<128x32xf32>
    %16 = arith.addf %13, %15 : vector<128x32xf32>
    %cst_16 = arith.constant 0.000000e+00 : f32
    %17 = vector.broadcast %cst_16 : f32 to vector<128x32xf32>
    %18 = arith.maximumf %16, %17 : vector<128x32xf32>
    %c0_17 = arith.constant 0 : index
    %c0_18 = arith.constant 0 : index
    %19 = vector.load %arg8[%c0_17, %c0_18] : memref<1x32xf32, #tpu.memory_space<vmem>>, vector<1x32xf32>
    %cst_19 = arith.constant dense<0.000000e+00> : vector<1x128xf32>
    %20 = tpu.matmul %19, %18, %cst_19 {dimension_numbers = #tpu.dot_dimension_numbers<[1], [1], [0], [0], [0, 0, 1, 0], [], []>} : vector<1x32xf32>, vector<128x32xf32>, vector<1x128xf32> -> vector<1x128xf32>
    %c0_20 = arith.constant 0 : index
    %c0_21 = arith.constant 0 : index
    %21 = vector.load %arg9[%c0_20, %c0_21] : memref<1x1xf32, #tpu.memory_space<vmem>>, vector<1x1xf32>
    %22 = vector.broadcast %21 : vector<1x1xf32> to vector<1x128xf32>
    %23 = arith.addf %20, %22 : vector<1x128xf32>
    %c0_22 = arith.constant 0 : index
    %c0_23 = arith.constant 0 : index
    %24 = vector.load %arg10[%c0_22, %c0_23] : memref<1x128xf32, #tpu.memory_space<vmem>>, vector<1x128xf32>
    tpu.vector_store %arg10[%c0_22, %c0_23], %23 {strides = array<i32>} : memref<1x128xf32, #tpu.memory_space<vmem>>, vector<1x128xf32>,
    return
  }
  func.func @transform_0(%arg0: i32) -> (i32, i32) {
    %c0_i32 = arith.constant 0 : i32
    %c0_i32_0 = arith.constant 0 : i32
    return %arg0, %c0_i32 : i32, i32
  }
  func.func @transform_1(%arg0: i32) -> (i32, i32) {
    %c0_i32 = arith.constant 0 : i32
    %c0_i32_0 = arith.constant 0 : i32
    return %arg0, %c0_i32 : i32, i32
  }
  func.func @transform_2(%arg0: i32) -> (i32, i32) {
    %c0_i32 = arith.constant 0 : i32
    %c0_i32_0 = arith.constant 0 : i32
    %c0_i32_1 = arith.constant 0 : i32
    return %c0_i32, %c0_i32_0 : i32, i32
  }
  func.func @transform_3(%arg0: i32) -> (i32, i32) {
    %c0_i32 = arith.constant 0 : i32
    %c0_i32_0 = arith.constant 0 : i32
    %c0_i32_1 = arith.constant 0 : i32
    return %c0_i32, %c0_i32_0 : i32, i32
  }
  func.func @transform_4(%arg0: i32) -> (i32, i32) {
    %c0_i32 = arith.constant 0 : i32
    %c0_i32_0 = arith.constant 0 : i32
    %c0_i32_1 = arith.constant 0 : i32
    return %c0_i32, %c0_i32_0 : i32, i32
  }
  func.func @transform_5(%arg0: i32) -> (i32, i32) {
    %c0_i32 = arith.constant 0 : i32
    %c0_i32_0 = arith.constant 0 : i32
    %c0_i32_1 = arith.constant 0 : i32
    return %c0_i32, %c0_i32_0 : i32, i32
  }
  func.func @transform_6(%arg0: i32) -> (i32, i32) {
    %c0_i32 = arith.constant 0 : i32
    %c0_i32_0 = arith.constant 0 : i32
    %c0_i32_1 = arith.constant 0 : i32
    return %c0_i32, %c0_i32_0 : i32, i32
  }
  func.func @transform_7(%arg0: i32) -> (i32, i32) {
    %c0_i32 = arith.constant 0 : i32
    %c0_i32_0 = arith.constant 0 : i32
    %c0_i32_1 = arith.constant 0 : i32
    return %c0_i32, %c0_i32_0 : i32, i32
  }
  func.func @transform_8(%arg0: i32) -> (i32, i32) {
    %c0_i32 = arith.constant 0 : i32
    %c0_i32_0 = arith.constant 0 : i32
    %c0_i32_1 = arith.constant 0 : i32
    return %c0_i32, %c0_i32_0 : i32, i32
  }
  func.func @transform_9(%arg0: i32) -> (i32, i32) {
    %c0_i32 = arith.constant 0 : i32
    %c0_i32_0 = arith.constant 0 : i32
    return %c0_i32, %arg0 : i32, i32
  }
}

</mosaic_0001>

<bundles_post_ra>
// kernel: tpu_custom_call.1
= control target key start
LH: loop header
LB: loop body
LE: loop exit
PB: predicated region body
PF: predicated region fallthrough
CT: control target
= control target key end

     0   :  { %s1456_s0 = inlined_call_operand.vmem [shape: f32[128,12], index: 0, kind: input, shape index: {}]   ;;  %s1457_s1 = inlined_call_operand.vmem [shape: f32[128,4], index: 1, kind: input, shape index: {}]   ;;  %s1458_s2 = inlined_call_operand.vmem [shape: f32[12,32], index: 2, kind: input, shape index: {}]   ;;  %s1459_s3 = inlined_call_operand.vmem [shape: f32[4,32], index: 3, kind: input, shape index: {}]   ;;  %s1460_s4 = inlined_call_operand.vmem [shape: f32[1,32], index: 4, kind: input, shape index: {}]   ;;  %s1461_s5 = inlined_call_operand.vmem [shape: f32[32,32], index: 5, kind: input, shape index: {}]   ;;  %s1462_s6 = inlined_call_operand.vmem [shape: f32[1,32], index: 6, kind: input, shape index: {}]   ;;  %s1463_s7 = inlined_call_operand.vmem [shape: f32[1,32], index: 7, kind: input, shape index: {}]   ;;  %s1464_s8 = inlined_call_operand.<no memory space> [shape: f32[1,1], index: 8, kind: input, shape index: {}]   ;;  %s1465_s9 = inlined_call_operand.hbm [shape: f32[1,128], index: 9, kind: output, shape index: {}]  }
   0x1   :  { %v14_v0 = vstv %s1464_s8 }
   0x2   :  { %15 = vst [vmem:[#allocation2] sm:$0x1] %v14_v0 }
   0x3   :  { %v69_v1 = vld [vmem:[%s1459_s3] sm:$0xf]  ;;  %vm119_vm0 = vcmask 1043456   ;;  %v52_v2 = vld [vmem:[%s1458_s2 + $0x8] sm:$0xf]  ;;  %vm70_vm1 = vcmask 31744  }
   0x4   :  { %v53_v3 = vld [vmem:[%s1457_s1] sm:$0xff]  ;;  %1013 = vmatprep.subr.msk.mxu0 %vm119_vm0, %v69_v1  ;;  %1039 = vmatprep.subr.msk.mxu1 %vm119_vm0, %v52_v2  ;;  %v54_v4 = vld [vmem:[%s1457_s1 + $0x8] sm:$0xff]  ;;  %vm268_vm2 = vcmask 97280   ;;  %v55_v7 = vld [vmem:[%s1457_s1 + $0x10] sm:$0xff] }
   0x5   :  { %v51_v5 = vld [vmem:[%s1458_s2] sm:$0xff]  ;;  %1014 = vmatpush3.msk.msra.mxu0 %vm119_vm0, %v69_v1  ;;  %1015 = vmatprep.mubr.msk.f32.mxu0 %vm70_vm1, %v53_v3  ;;  %v36_v8 = vld [vmem:[%s1456_s0 + $0x8] sm:$0xff]  ;;  %v56_v9 = vld [vmem:[%s1457_s1 + $0x18] sm:$0xff] }
   0x6   :  { %v35_v6 = vld [vmem:[%s1456_s0] sm:$0xff]  ;;  %1040 = vmatpush3.msk.msra.mxu1 %vm119_vm0, %v52_v2  ;;  %1016 = vmatmul.mubr.msk.f32.vlgmr.msra.gmra.mxu0 %vm70_vm1, %v54_v4  ;;  %v37_v10 = vld [vmem:[%s1456_s0 + $0x10] sm:$0xff]  ;;  %v38_v12 = vld [vmem:[%s1456_s0 + $0x18] sm:$0xff] }
   0x7   :  { %1041 = vmatprep.subr.mxu1 %v51_v5  ;;  %1043 = vmatprep.mubr.msk.f32.mxu1 %vm268_vm2, %v35_v6  ;;  %v57_v11 = vld [vmem:[%s1457_s1 + $0x20] sm:$0xff]  ;;  %v58_v13 = vld [vmem:[%s1457_s1 + $0x28] sm:$0xff]  ;;  %v59_v15 = vld [vmem:[%s1457_s1 + $0x30] sm:$0xff] }
   0x8   :  { %1042 = vmatpush3.msra.mxu1 %v51_v5  ;;  %1018 = vmatprep.mubr.msk.f32.mxu0 %vm70_vm1, %v55_v7  ;;  %v39_v14 = vld [vmem:[%s1456_s0 + $0x20] sm:$0xff]  ;;  %v40_v16 = vld [vmem:[%s1456_s0 + $0x28] sm:$0xff]  ;;  %v60_v17 = vld [vmem:[%s1457_s1 + $0x38] sm:$0xff] }
   0x9   :  { %1044 = vmatmul.mubr.msk.f32.vlgmr.msra.gmra.mxu1 %vm268_vm2, %v36_v8  ;;  %v507_v18 = vld [vmem:[%s1461_s5 + $0x18] sm:$0xff]  ;;  %v41_v19 = vld [vmem:[%s1456_s0 + $0x30] sm:$0xff] }
   0xa   :  { %1019 = vmatmul.mubr.msk.f32.gmra.mxu0 %vm70_vm1, %v56_v9  ;;  %1046 = vmatprep.mubr.msk.f32.mxu1 %vm268_vm2, %v37_v10  ;;  %v506_v20 = vld [vmem:[%s1461_s5 + $0x10] sm:$0xff] }
   0xb   :  { %1021 = vmatprep.mubr.msk.f32.mxu0 %vm70_vm1, %v57_v11  ;;  %1067 = vmatprep.subr.mxu0 %v507_v18 }
   0xd   :  { %1047 = vmatmul.mubr.msk.f32.gmra.mxu1 %vm268_vm2, %v38_v12 }
   0xe   :  { %1022 = vmatmul.mubr.msk.f32.gmra.mxu0 %vm70_vm1, %v58_v13  ;;  %1049 = vmatprep.mubr.msk.f32.mxu1 %vm268_vm2, %v39_v14 }
   0xf   :  { %1024 = vmatprep.mubr.msk.f32.mxu0 %vm70_vm1, %v59_v15 }
  0x10   :  { %16 = vsyncpa [#allocation4], 0  ;;  %v61_v21 = vld [vmem:[%s1457_s1 + $0x40] sm:$0xff]  ;;  %1068 = vmatpush3.msra.mxu0 %v507_v18  ;;  %v505_v22 = vld [vmem:[%s1461_s5 + $0x8] sm:$0xff]  ;;  %vm515_vm3 = vcmask 261120   ;;  %vm1162_vm4 = vmmov 0  }
  0x11   :  { %1050 = vmatmul.mubr.msk.f32.gmra.mxu1 %vm268_vm2, %v40_v16  ;;  %1069 = vmatprep.subr.mxu0 %v506_v20  ;;  %v42_v23 = vld [vmem:[%s1456_s0 + $0x38] sm:$0xff]  ;;  %v62_v24 = vld [vmem:[%s1457_s1 + $0x48] sm:$0xff]  ;;  %v43_v25 = vld [vmem:[%s1456_s0 + $0x40] sm:$0xff]  ;;  %s1164_s18 = smov [#allocation3]  }
  0x12   :  { %1025 = vmatmul.mubr.msk.f32.gmra.mxu0 %vm70_vm1, %v60_v17  ;;  %1052 = vmatprep.mubr.msk.f32.mxu1 %vm268_vm2, %v41_v19  ;;  %v63_v26 = vld [vmem:[%s1457_s1 + $0x50] sm:$0xff]  ;;  %v44_v27 = vld [vmem:[%s1456_s0 + $0x48] sm:$0xff]  ;;  %v64_v28 = vld [vmem:[%s1457_s1 + $0x58] sm:$0xff]  ;;  %s864_s8 = sshll.u32 %s1164_s18, 4  ;;  %s865_s8 = int_to_ptr.vmem [resolvable:$true] %s864_s8 }
  0x13   :  { %1027 = vmatprep.mubr.msk.f32.mxu0 %vm70_vm1, %v61_v21  ;;  %1070 = vmatpush3.msra.mxu0 %v506_v20  ;;  %v45_v29 = vld [vmem:[%s1456_s0 + $0x50] sm:$0xff]  ;;  %v65_v30 = vld [vmem:[%s1457_s1 + $0x60] sm:$0xff]  ;;  %v46_v31 = vld [vmem:[%s1456_s0 + $0x58] sm:$0xff]  ;;  %s1139_s19 = scalar_lea.vmem %s865_s8, 16  ;;  %s1143_s3 = scalar_lea.vmem %s865_s8, 32 }
  0x14   :  { %1071 = vmatprep.subr.mxu0 %v505_v22  ;;  %v66_v32 = vld [vmem:[%s1457_s1 + $0x68] sm:$0xff]  ;;  %v47_v33 = vld [vmem:[%s1456_s0 + $0x60] sm:$0xff]  ;;  %v67_v34 = vld [vmem:[%s1457_s1 + $0x70] sm:$0xff]  ;;  %p1140_p0 = scmp.ne.s32.totalorder %s865_s8, %s1139_s19  ;;  %p1144_p1 = scmp.lt.s32.totalorder %s865_s8, %s865_s8 }
  0x15   :  { %1053 = vmatmul.mubr.msk.f32.gmra.mxu1 %vm268_vm2, %v42_v23  ;;  %1072 = vmatpush3.msra.mxu0 %v505_v22  ;;  %v48_v35 = vld [vmem:[%s1456_s0 + $0x68] sm:$0xff]  ;;  %v68_v36 = vld [vmem:[%s1457_s1 + $0x78] sm:$0xff]  ;;  %v49_v37 = vld [vmem:[%s1456_s0 + $0x70] sm:$0xff]  ;;  %p1145_p2 = scmp.lt.s32.totalorder %s1143_s3, %s1139_s19 }
  0x16   :  { %1028 = vmatmul.mubr.msk.f32.gmra.mxu0 %vm70_vm1, %v62_v24  ;;  %1055 = vmatprep.mubr.msk.f32.mxu1 %vm268_vm2, %v43_v25  ;;  %v50_v38 = vld [vmem:[%s1456_s0 + $0x78] sm:$0xff]  ;;  %v504_v39 = vld [vmem:[%s1461_s5] sm:$0xff] }
  0x17   :  { %1030 = vmatprep.mubr.msk.f32.mxu0 %vm70_vm1, %v63_v26  ;;  %1073 = vmatprep.subr.mxu0 %v504_v39  ;;  %v1370_v44 = vld [vmem:[%s1460_s4] ss:$0 sm:$0xff]  ;;  %p1146_p3 = por %p1145_p2, %p1144_p1 }
  0x18   :  { %1074 = vmatpush3.msra.mxu0 %v504_v39 }
  0x19   :  { %1056 = vmatmul.mubr.msk.f32.gmra.mxu1 %vm268_vm2, %v44_v27  ;;  %p1147_p4 = pnand %p1146_p3, %p1140_p0 }
  0x1a   :  { %1031 = vmatmul.mubr.msk.f32.gmra.mxu0 %vm70_vm1, %v64_v28  ;;  %1058 = vmatprep.mubr.msk.f32.mxu1 %vm268_vm2, %v45_v29 }
  0x1b   :  { %1033 = vmatprep.mubr.msk.f32.mxu0 %vm70_vm1, %v65_v30 }
  0x1d   :  { %1059 = vmatmul.mubr.msk.f32.gmra.mxu1 %vm268_vm2, %v46_v31 }
  0x1e   :  { %1034 = vmatmul.mubr.msk.f32.gmra.mxu0 %vm70_vm1, %v66_v32  ;;  %1061 = vmatprep.mubr.msk.f32.mxu1 %vm268_vm2, %v47_v33 }
  0x1f   :  { %1036 = vmatprep.mubr.msk.f32.mxu0 %vm70_vm1, %v67_v34 }
  0x21   :  { %1062 = vmatmul.mubr.msk.f32.gmra.mxu1 %vm268_vm2, %v48_v35 }
  0x22   :  { %1037 = vmatmul.mubr.msk.f32.gmra.mxu0 %vm70_vm1, %v68_v36  ;;  %1064 = vmatprep.mubr.msk.f32.mxu1 %vm268_vm2, %v49_v37 }
  0x25   :  { %1065 = vmatmul.mubr.msk.f32.gmra.mxu1 %vm268_vm2, %v50_v38 }
  0xc6   :  { %v1017_v40 = vpop.f32.mrf.mxu0 }
  0xc8   :  { %v189_v41 = vpop.f32.mrf.mxu0 }
  0xc9   :  { %v1045_v42 = vpop.f32.mrf.mxu1 }
  0xca   :  { %v392_v43 = vadd.f32 %v1045_v42, %v1017_v40  ;;  %v1020_v45 = vpop.f32.mrf.mxu0 }
  0xcb   :  { %v386_v46 = vpop.f32.mrf.mxu1 }
  0xcc   :  { %v387_v47 = vadd.f32 %v386_v46, %v189_v41  ;;  %v199_v48 = vpop.f32.mrf.mxu0  ;;  %v473_v49 = vadd.f32 %v1370_v44, %v392_v43 }
  0xcd   :  { %v1048_v50 = vpop.f32.mrf.mxu1 }
  0xce   :  { %v472_v51 = vadd.f32 %v1370_v44, %v387_v47  ;;  %v402_v52 = vadd.f32 %v1048_v50, %v1020_v45  ;;  %v1023_v53 = vpop.f32.mrf.mxu0  ;;  %v489_v58 = vmax.f32 %v473_v49, 0.0 }
  0xcf   :  { %v396_v54 = vpop.f32.mrf.mxu1 }
  0xd0   :  { %v488_v55 = vmax.f32 %v472_v51, 0.0  ;;  %v397_v56 = vadd.f32 %v396_v54, %v199_v48  ;;  %v209_v57 = vpop.f32.mrf.mxu0  ;;  %v475_v59 = vadd.f32 %v1370_v44, %v402_v52 }
  0xd1   :  { %v1051_v60 = vpop.f32.mrf.mxu1 }
  0xd2   :  { %v474_v61 = vadd.f32 %v1370_v44, %v397_v56  ;;  %v412_v62 = vadd.f32 %v1051_v60, %v1023_v53  ;;  %1075 = vmatprep.mubr.msk.f32.mxu0 %vm515_vm3, %v488_v55  ;;  %v1026_v63 = vpop.f32.mrf.mxu0  ;;  %v491_v4 = vmax.f32 %v475_v59, 0.0  ;;  %v726_v59 = vld [vmem:[#allocation2] sm:$0x1]  ;;  %v1163_v60 = vmov 0  }
  0xd3   :  { %v406_v0 = vpop.f32.mrf.mxu1  ;;  %1076 = vmatmul.mubr.msk.f32.vlgmr.msra.gmra.mxu0 %vm515_vm3, %v489_v58  ;;  %v1161_v58 = vmov 0.0   ;;  %1138 = vset.pattern.permute.xlu0 %v1163_v60 }
  0xd4   :  { %v490_v1 = vmax.f32 %v474_v61, 0.0  ;;  %v407_v2 = vadd.f32 %v406_v0, %v209_v57  ;;  %v219_v3 = vpop.f32.mrf.mxu0  ;;  %v477_v5 = vadd.f32 %v1370_v44, %v412_v62  ;;  %1099 = vmatprep.subr.mxu1 %v1161_v58  ;;  %1131 = vmatprep.mubr.msk.f32.mxu1 %vm1162_vm4, %v1161_v58 }
  0xd5   :  { %v1054_v6 = vpop.f32.mrf.mxu1  ;;  %729 = vperm.xlu0 %1138, %v726_v59  }
  0xd6   :  { %v476_v7 = vadd.f32 %v1370_v44, %v407_v2  ;;  %v422_v8 = vadd.f32 %v1054_v6, %v1026_v63  ;;  %1078 = vmatprep.mubr.msk.f32.mxu0 %vm515_vm3, %v490_v1  ;;  %v1029_v9 = vpop.f32.mrf.mxu0  ;;  %v493_v14 = vmax.f32 %v477_v5, 0.0 }
  0xd7   :  { %v416_v10 = vpop.f32.mrf.mxu1  ;;  %1079 = vmatmul.mubr.msk.f32.gmra.mxu0 %vm515_vm3, %v491_v4 }
  0xd8   :  { %v492_v11 = vmax.f32 %v476_v7, 0.0  ;;  %v417_v12 = vadd.f32 %v416_v10, %v219_v3  ;;  %v229_v13 = vpop.f32.mrf.mxu0  ;;  %v479_v15 = vadd.f32 %v1370_v44, %v422_v8  ;;  %v907_v10 = vld [vmem:[%s1462_s6] ss:$0 sm:$0xff] }
  0xd9   :  { %v1057_v16 = vpop.f32.mrf.mxu1 }
  0xda   :  { %v478_v17 = vadd.f32 %v1370_v44, %v417_v12  ;;  %v432_v18 = vadd.f32 %v1057_v16, %v1029_v9  ;;  %1081 = vmatprep.mubr.msk.f32.mxu0 %vm515_vm3, %v492_v11  ;;  %v1032_v19 = vpop.f32.mrf.mxu0  ;;  %v495_v24 = vmax.f32 %v479_v15, 0.0 }
  0xdb   :  { %v426_v20 = vpop.f32.mrf.mxu1  ;;  %1082 = vmatmul.mubr.msk.f32.gmra.mxu0 %vm515_vm3, %v493_v14 }
  0xdc   :  { %v494_v21 = vmax.f32 %v478_v17, 0.0  ;;  %v427_v22 = vadd.f32 %v426_v20, %v229_v13  ;;  %v239_v23 = vpop.f32.mrf.mxu0  ;;  %v481_v25 = vadd.f32 %v1370_v44, %v432_v18 }
  0xdd   :  { %v1060_v26 = vpop.f32.mrf.mxu1 }
  0xde   :  { %v480_v27 = vadd.f32 %v1370_v44, %v427_v22  ;;  %v442_v28 = vadd.f32 %v1060_v26, %v1032_v19  ;;  %1084 = vmatprep.mubr.msk.f32.mxu0 %vm515_vm3, %v494_v21  ;;  %v1035_v29 = vpop.f32.mrf.mxu0  ;;  %v497_v34 = vmax.f32 %v481_v25, 0.0 }
  0xdf   :  { %v436_v30 = vpop.f32.mrf.mxu1  ;;  %1085 = vmatmul.mubr.msk.f32.gmra.mxu0 %vm515_vm3, %v495_v24 }
  0xe0   :  { %v496_v31 = vmax.f32 %v480_v27, 0.0  ;;  %v437_v32 = vadd.f32 %v436_v30, %v239_v23  ;;  %v249_v33 = vpop.f32.mrf.mxu0  ;;  %v483_v35 = vadd.f32 %v1370_v44, %v442_v28 }
  0xe1   :  { %v1063_v36 = vpop.f32.mrf.mxu1 }
  0xe2   :  { %v482_v37 = vadd.f32 %v1370_v44, %v437_v32  ;;  %v452_v38 = vadd.f32 %v1063_v36, %v1035_v29  ;;  %1087 = vmatprep.mubr.msk.f32.mxu0 %vm515_vm3, %v496_v31  ;;  %v1038_v39 = vpop.f32.mrf.mxu0  ;;  %v499_v43 = vmax.f32 %v483_v35, 0.0 }
  0xe3   :  { %v446_v40 = vpop.f32.mrf.mxu1  ;;  %1088 = vmatmul.mubr.msk.f32.gmra.mxu0 %vm515_vm3, %v497_v34 }
  0xe4   :  { %v498_v41 = vmax.f32 %v482_v37, 0.0  ;;  %v447_v42 = vadd.f32 %v446_v40, %v249_v33  ;;  %v485_v45 = vadd.f32 %v1370_v44, %v452_v38  ;;  %v259_v49 = vpop.f32.mrf.mxu0 }
  0xe5   :  { %v1066_v46 = vpop.f32.mrf.mxu1 }
  0xe6   :  { %v484_v47 = vadd.f32 %v1370_v44, %v447_v42  ;;  %v462_v48 = vadd.f32 %v1066_v46, %v1038_v39  ;;  %1090 = vmatprep.mubr.msk.f32.mxu0 %vm515_vm3, %v498_v41  ;;  %v501_v53 = vmax.f32 %v485_v45, 0.0  ;;  %v725_v46 = vld [vmem:[%s1463_s7] sm:$0x1] }
  0xe7   :  { %v456_v50 = vpop.f32.mrf.mxu1  ;;  %1091 = vmatmul.mubr.msk.f32.gmra.mxu0 %vm515_vm3, %v499_v43 }
  0xe8   :  { %v500_v51 = vmax.f32 %v484_v47, 0.0  ;;  %v457_v52 = vadd.f32 %v456_v50, %v259_v49  ;;  %v487_v54 = vadd.f32 %v1370_v44, %v462_v48  ;;  %v732_v47 = vlaneseq }
  0xea   :  { %v486_v55 = vadd.f32 %v1370_v44, %v457_v52  ;;  %1093 = vmatprep.mubr.msk.f32.mxu0 %vm515_vm3, %v500_v51  ;;  %v503_v57 = vmax.f32 %v487_v54, 0.0  ;;  %v733_v48 = vshrl.u32 %v732_v47, 7 }
  0xeb   :  { %1094 = vmatmul.mubr.msk.f32.gmra.mxu0 %vm515_vm3, %v501_v53 }
  0xec   :  { %v502_v56 = vmax.f32 %v486_v55, 0.0  ;;  %v734_v49 = vsub.s32 0, %v733_v48 }
  0xee   :  { %1096 = vmatprep.mubr.msk.f32.mxu0 %vm515_vm3, %v502_v56 }
  0xef   :  { %1097 = vmatmul.mubr.msk.f32.gmra.mxu0 %vm515_vm3, %v503_v57 }
 0x150   :  { %v730_v50 = vpop.permute.xlu0 %729 }
 0x151   :  { %v735_v51 = vrot.slane %v730_v50, %v734_v49 }
 0x193   :  { %v1406_v44 = vpop.f32.mrf.mxu0 }
 0x194   :  { %v636_v40 = vadd.f32 %v1406_v44, %v907_v10 }
 0x195   :  { %v1408_v61 = vpop.f32.mrf.mxu0 }
 0x196   :  { %v710_v42 = vmax.f32 %v636_v40, 0.0  ;;  %v631_v43 = vadd.f32 %v907_v10, %v1408_v61 }
 0x197   :  { %v1080_v62 = vpop.f32.mrf.mxu0 }
 0x198   :  { %v646_v36 = vadd.f32 %v1080_v62, %v907_v10  ;;  %v709_v45 = vmax.f32 %v631_v43, 0.0 }
 0x199   :  { %v1410_v63 = vpop.f32.mrf.mxu0 }
 0x19a   :  { %v712_v38 = vmax.f32 %v646_v36, 0.0  ;;  %v641_v39 = vadd.f32 %v907_v10, %v1410_v63 }
 0x19b   :  { %v1083_v0 = vpop.f32.mrf.mxu0 }
 0x19c   :  { %v656_v32 = vadd.f32 %v1083_v0, %v907_v10  ;;  %v711_v41 = vmax.f32 %v641_v39, 0.0 }
 0x19d   :  { %v650_v1 = vpop.f32.mrf.mxu0 }
 0x19e   :  { %v714_v34 = vmax.f32 %v656_v32, 0.0  ;;  %v651_v35 = vadd.f32 %v907_v10, %v650_v1 }
 0x19f   :  { %v1086_v2 = vpop.f32.mrf.mxu0 }
 0x1a0   :  { %v666_v28 = vadd.f32 %v1086_v2, %v907_v10  ;;  %v713_v37 = vmax.f32 %v651_v35, 0.0 }
 0x1a1   :  { %v660_v3 = vpop.f32.mrf.mxu0 }
 0x1a2   :  { %v716_v30 = vmax.f32 %v666_v28, 0.0  ;;  %v661_v31 = vadd.f32 %v907_v10, %v660_v3 }
 0x1a3   :  { %v1089_v4 = vpop.f32.mrf.mxu0 }
 0x1a4   :  { %v676_v24 = vadd.f32 %v1089_v4, %v907_v10  ;;  %v715_v33 = vmax.f32 %v661_v31, 0.0 }
 0x1a5   :  { %v670_v5 = vpop.f32.mrf.mxu0 }
 0x1a6   :  { %v718_v26 = vmax.f32 %v676_v24, 0.0  ;;  %v671_v27 = vadd.f32 %v907_v10, %v670_v5 }
 0x1a7   :  { %v1092_v6 = vpop.f32.mrf.mxu0 }
 0x1a8   :  { %v686_v20 = vadd.f32 %v1092_v6, %v907_v10  ;;  %v717_v29 = vmax.f32 %v671_v27, 0.0 }
 0x1a9   :  { %v680_v7 = vpop.f32.mrf.mxu0 }
 0x1aa   :  { %v720_v22 = vmax.f32 %v686_v20, 0.0  ;;  %v681_v23 = vadd.f32 %v907_v10, %v680_v7 }
 0x1ab   :  { %v1095_v8 = vpop.f32.mrf.mxu0 }
 0x1ac   :  { %v696_v16 = vadd.f32 %v1095_v8, %v907_v10  ;;  %v719_v25 = vmax.f32 %v681_v23, 0.0 }
 0x1ad   :  { %v690_v9 = vpop.f32.mrf.mxu0 }
 0x1ae   :  { %v722_v18 = vmax.f32 %v696_v16, 0.0  ;;  %v691_v19 = vadd.f32 %v907_v10, %v690_v9 }
 0x1af   :  { %v1098_v11 = vpop.f32.mrf.mxu0 }
 0x1b0   :  { %v706_v12 = vadd.f32 %v1098_v11, %v907_v10  ;;  %v721_v21 = vmax.f32 %v691_v19, 0.0 }
 0x1b1   :  { %v700_v13 = vpop.f32.mrf.mxu0 }
 0x1b2   :  { %v724_v14 = vmax.f32 %v706_v12, 0.0  ;;  %v701_v15 = vadd.f32 %v907_v10, %v700_v13 }
 0x1b4   :  { %1100 = vmatpush3.xpose.msk.msra.mxu1 %vm515_vm3, %v724_v14  ;;  %v723_v17 = vmax.f32 %v701_v15, 0.0 }
 0x1b5   :  { %1101 = vmatprep.subr.mxu1 %v1161_v58 }
 0x1b8   :  { %1102 = vmatpush3.xpose.msk.msra.mxu1 %vm515_vm3, %v723_v17 }
 0x1b9   :  { %1103 = vmatprep.subr.mxu1 %v1161_v58 }
 0x1bc   :  { %1104 = vmatpush3.xpose.msk.msra.mxu1 %vm515_vm3, %v722_v18 }
 0x1bd   :  { %1105 = vmatprep.subr.mxu1 %v1161_v58 }
 0x1c0   :  { %1106 = vmatpush3.xpose.msk.msra.mxu1 %vm515_vm3, %v721_v21 }
 0x1c1   :  { %1107 = vmatprep.subr.mxu1 %v1161_v58 }
 0x1c4   :  { %1108 = vmatpush3.xpose.msk.msra.mxu1 %vm515_vm3, %v720_v22 }
 0x1c5   :  { %1109 = vmatprep.subr.mxu1 %v1161_v58 }
 0x1c8   :  { %1110 = vmatpush3.xpose.msk.msra.mxu1 %vm515_vm3, %v719_v25 }
 0x1c9   :  { %1111 = vmatprep.subr.mxu1 %v1161_v58 }
 0x1cc   :  { %1112 = vmatpush3.xpose.msk.msra.mxu1 %vm515_vm3, %v718_v26 }
 0x1cd   :  { %1113 = vmatprep.subr.mxu1 %v1161_v58 }
 0x1d0   :  { %1114 = vmatpush3.xpose.msk.msra.mxu1 %vm515_vm3, %v717_v29 }
 0x1d1   :  { %1115 = vmatprep.subr.mxu1 %v1161_v58 }
 0x1d4   :  { %1116 = vmatpush3.xpose.msk.msra.mxu1 %vm515_vm3, %v716_v30 }
 0x1d5   :  { %1117 = vmatprep.subr.mxu1 %v1161_v58 }
 0x1d8   :  { %1118 = vmatpush3.xpose.msk.msra.mxu1 %vm515_vm3, %v715_v33 }
 0x1d9   :  { %1119 = vmatprep.subr.mxu1 %v1161_v58 }
 0x1dc   :  { %1120 = vmatpush3.xpose.msk.msra.mxu1 %vm515_vm3, %v714_v34 }
 0x1dd   :  { %1121 = vmatprep.subr.mxu1 %v1161_v58 }
 0x1e0   :  { %1122 = vmatpush3.xpose.msk.msra.mxu1 %vm515_vm3, %v713_v37 }
 0x1e1   :  { %1123 = vmatprep.subr.mxu1 %v1161_v58 }
 0x1e4   :  { %1124 = vmatpush3.xpose.msk.msra.mxu1 %vm515_vm3, %v712_v38 }
 0x1e5   :  { %1125 = vmatprep.subr.mxu1 %v1161_v58 }
 0x1e8   :  { %1126 = vmatpush3.xpose.msk.msra.mxu1 %vm515_vm3, %v711_v41 }
 0x1e9   :  { %1127 = vmatprep.subr.mxu1 %v1161_v58 }
 0x1ec   :  { %1128 = vmatpush3.xpose.msk.msra.mxu1 %vm515_vm3, %v710_v42 }
 0x1ed   :  { %1129 = vmatprep.subr.mxu1 %v1161_v58 }
 0x1f0   :  { %1130 = vmatpush3.xpose.msk.msra.mxu1 %vm515_vm3, %v709_v45 }
 0x1f3   :  { %1132 = vmatmul.mubr.msk.f32.vlgmr.msra.gmra.mxu1 %vm515_vm3, %v725_v46 }
 0x2b3   :  { %v853_v52 = vpop.f32.mrf.mxu1 }
 0x2b4   :  { %v854_v53 = vadd.f32 %v853_v52, %v735_v51 }
 0x2b5   :  { %v1133_v54 = vpop.f32.mrf.mxu1 }
 0x2b6   :  { %857 = vst [vmem:[#allocation3] sm:$0x1] %v854_v53 }
 0x2b7   :  { %1150 = shalt.err (!%p1147_p4)
}
 0x2b8   :  { %867 = dma.vmem_to_hbm [thread:$0]  %s865_s8, 16, %s1465_s9, [#allocation4]  }
 0x2b9   :  { %1159 = dma.done.wait [#allocation4], 16  }
 0x2ba   :  { %1160 = vsyncadd [#allocation4], 4294967280 }
 0x2bb   :  { %871 = vsyncpa [#allocation4], 1 }

</bundles_post_ra>
